<compile_context>
chip_gen: v6e
topology: v6e:2x2x1
jax: 0.10.0
libtpu: 0.0.40
codegen_flags: <defaults>
</compile_context>

<pallas_src>
import jax
import jax.numpy as jnp
from jax.experimental import pallas as pl
from jax.experimental.pallas import tpu as pltpu


def _make_snn_kernel(T, BP):
    """Build the kernel body for static (T, padded batch BP)."""

    def _if_scan(h_all, th, width):
        """Unrolled IF-neuron scan over T; returns stacked float spikes."""
        mem = jnp.zeros((BP, width), jnp.float32)
        sp = jnp.zeros((BP, width), jnp.bool_)      # spike at t-1
        pv = jnp.zeros((BP, width), jnp.bool_)      # spike at t-2 (drives reset)
        spikes = []
        for t in range(T):
            h = h_all[t * BP:(t + 1) * BP, :]       # static, sublane-aligned slab
            mem = jnp.where(pv, h, mem + h)         # soft reset (spike is 0/1)
            pv = sp
            sp = mem >= th
            spikes.append(sp.astype(jnp.float32))
        return jnp.concatenate(spikes, axis=0)      # (T*BP, width)

    def _snn_kernel(x_ref, w1_ref, b1_ref, w2_ref, b2_ref, w3_ref, b3_ref,
                    th_ref, o_ref):
        H = w1_ref.shape[1]
        O = w3_ref.shape[1]

        # fc1 for all timesteps at once (no temporal dependency).
        h1 = jnp.dot(x_ref[...], w1_ref[...],
                     preferred_element_type=jnp.float32) + b1_ref[...]
        s1 = _if_scan(h1, th_ref[0], H)

        # fc2 / fc3 over the whole spike train: the recurrence is only in the
        # IF scans, so each layer is ONE matmul at M = T*BP rows.
        h2 = jnp.dot(s1, w2_ref[...],
                     preferred_element_type=jnp.float32) + b2_ref[...]
        s2 = _if_scan(h2, th_ref[1], H)

        h3 = jnp.dot(s2, w3_ref[...],
                     preferred_element_type=jnp.float32) + b3_ref[...]
        s3 = _if_scan(h3, th_ref[2], O)

        # Single store of the whole (T*BP, O) slab -> one HBM writeback DMA.
        o_ref[...] = s3

    return _snn_kernel


@jax.jit
def snn_forward(x, params):
    """x: (B, input_size, T) f32 -> (B, output_size, T) f32 spike train."""
    w1, b1, w2, b2, w3, b3, thresholds = params
    B, I, T = x.shape
    H = w1.shape[0]            # fc1: (hidden, input)  PyTorch convention
    O = w3.shape[0]            # fc3: (output, hidden)
    BP = ((B + 7) // 8) * 8    # pad batch to a sublane multiple

    # Time-major, batch-padded, flattened so fc1 is one (T*BP, I) matmul.
    x_tm = jnp.transpose(x, (2, 0, 1)).astype(jnp.float32)      # (T, B, I)
    x_tm = jnp.pad(x_tm, ((0, 0), (0, BP - B), (0, 0)))         # (T, BP, I)
    x_tm = x_tm.reshape(T * BP, I)

    w1t = w1.T.astype(jnp.float32)                # (I, H): kernel does x @ W^T
    w2t = w2.T.astype(jnp.float32)                # (H, H)
    w3t = w3.T.astype(jnp.float32)                # (H, O)
    b1r = b1.reshape(1, H).astype(jnp.float32)
    b2r = b2.reshape(1, H).astype(jnp.float32)
    b3r = b3.reshape(1, O).astype(jnp.float32)
    th = thresholds.astype(jnp.float32)

    out_flat = pl.pallas_call(
        _make_snn_kernel(T, BP),
        out_shape=jax.ShapeDtypeStruct((T * BP, O), jnp.float32),
        # grid=() : single invocation, everything resident in VMEM / SMEM.
        in_specs=[
            pl.BlockSpec(memory_space=pltpu.MemorySpace.VMEM),   # x (T*BP, I)
            pl.BlockSpec(memory_space=pltpu.MemorySpace.VMEM),   # W1^T
            pl.BlockSpec(memory_space=pltpu.MemorySpace.VMEM),   # b1
            pl.BlockSpec(memory_space=pltpu.MemorySpace.VMEM),   # W2^T
            pl.BlockSpec(memory_space=pltpu.MemorySpace.VMEM),   # b2
            pl.BlockSpec(memory_space=pltpu.MemorySpace.VMEM),   # W3^T
            pl.BlockSpec(memory_space=pltpu.MemorySpace.VMEM),   # b3
            pl.BlockSpec(memory_space=pltpu.MemorySpace.SMEM),   # thresholds (3,)
        ],
        out_specs=pl.BlockSpec(memory_space=pltpu.MemorySpace.VMEM),
    )(x_tm, w1t, b1r, w2t, b2r, w3t, b3r, th)

    # Strip batch padding and return the PyTorch (B, output_size, T) layout.
    out = out_flat.reshape(T, BP, O)[:, :B, :]
    return jnp.transpose(out, (1, 2, 0))


def snn_forward_ref(x, params):
    """Pure-JAX step-by-step reference replicating the PyTorch module."""
    w1, b1, w2, b2, w3, b3, th = params
    B, I, T = x.shape
    H = w1.shape[0]
    O = w3.shape[0]
    hi = jax.lax.Precision.HIGHEST

    def linear(v, w, b):
        return jnp.dot(v, w.T, precision=hi) + b

    def if_step(h, state, thr):
        mem, sp, pv = state
        mem = mem * (1.0 - pv) + h
        pv = sp
        sp = (mem >= thr).astype(jnp.float32)
        return sp, (mem, sp, pv)

    z_h = jnp.zeros((B, H), jnp.float32)
    z_o = jnp.zeros((B, O), jnp.float32)
    st1 = (z_h, z_h, z_h)
    st2 = (z_h, z_h, z_h)
    st3 = (z_o, z_o, z_o)
    outs = []
    for t in range(T):
        h1 = linear(x[:, :, t], w1, b1)
        s1, st1 = if_step(h1, st1, th[0])
        h2 = linear(s1, w2, b2)
        s2, st2 = if_step(h2, st2, th[1])
        h3 = linear(s2, w3, b3)
        s3, st3 = if_step(h3, st3, th[2])
        outs.append(s3)
    return jnp.stack(outs, axis=2)   # (B, O, T)


def init_params(key, input_size, hidden_size, output_size):
    """Deterministic PyTorch-Linear-style init: U(-1/sqrt(fan_in), 1/sqrt(fan_in))."""
    ks = jax.random.split(key, 6)

    def lin(kw, kb, out_f, in_f):
        bound = 1.0 / jnp.sqrt(in_f)
        w = jax.random.uniform(kw, (out_f, in_f), jnp.float32, -bound, bound)
        b = jax.random.uniform(kb, (out_f,), jnp.float32, -bound, bound)
        return w, b

    w1, b1 = lin(ks[0], ks[1], hidden_size, input_size)
    w2, b2 = lin(ks[2], ks[3], hidden_size, hidden_size)
    w3, b3 = lin(ks[4], ks[5], output_size, hidden_size)
    thresholds = jnp.ones((3,), jnp.float32)   # lif1 / lif2 / lif3 thresholds
    return (w1, b1, w2, b2, w3, b3, thresholds)


if __name__ == "__main__":
    B, INPUT, HIDDEN, OUTPUT, T = 2, 32, 32, 16, 8

    key = jax.random.PRNGKey(0)
    kx, kp = jax.random.split(key)
    x = jax.random.normal(kx, (B, INPUT, T), jnp.float32)   # PyTorch (B, C, T)
    params = init_params(kp, INPUT, HIDDEN, OUTPUT)

    out = jax.block_until_ready(snn_forward(x, params))
    assert out.shape == (B, OUTPUT, T)
    # Outputs are spike trains: every element must be exactly 0.0 or 1.0.
    assert bool(jnp.all((out == 0.0) | (out == 1.0)))

    # Sanity check against the pure-JAX reference. Expected mismatch ≈ 0; a
    # generous bound tolerates rare threshold-edge flips from differing matmul
    # accumulation order while still catching any structural error.
    ref = jax.block_until_ready(snn_forward_ref(x, params))
    mismatch = float(jnp.mean(jnp.abs(out - ref)))
    assert mismatch < 0.15, f"spike mismatch fraction too high: {mismatch}"

    print("KERNEL_OK")
</pallas_src>

<mosaic_0001>
module attributes {stable_mosaic.version = 11 : i64} {
  func.func @_snn_kernel(%arg0: memref<64x32xf32, #tpu.memory_space<vmem>>, %arg1: memref<32x32xf32, #tpu.memory_space<vmem>>, %arg2: memref<1x32xf32, #tpu.memory_space<vmem>>, %arg3: memref<32x32xf32, #tpu.memory_space<vmem>>, %arg4: memref<1x32xf32, #tpu.memory_space<vmem>>, %arg5: memref<32x16xf32, #tpu.memory_space<vmem>>, %arg6: memref<1x16xf32, #tpu.memory_space<vmem>>, %arg7: memref<3xf32, #tpu.memory_space<smem>>, %arg8: memref<64x16xf32, #tpu.memory_space<vmem>>) attributes {dimension_semantics = [], scalar_prefetch = 0 : i64, scratch_operands = 0 : i64, tpu.core_type = #tpu.core_type<tc>} {
    %c0 = arith.constant 0 : index
    %c0_0 = arith.constant 0 : index
    %0 = vector.load %arg0[%c0, %c0_0] : memref<64x32xf32, #tpu.memory_space<vmem>>, vector<64x32xf32>
    %c0_1 = arith.constant 0 : index
    %c0_2 = arith.constant 0 : index
    %1 = vector.load %arg1[%c0_1, %c0_2] : memref<32x32xf32, #tpu.memory_space<vmem>>, vector<32x32xf32>
    %cst = arith.constant dense<0.000000e+00> : vector<64x32xf32>
    %2 = tpu.matmul %0, %1, %cst {dimension_numbers = #tpu.dot_dimension_numbers<[1], [0], [0], [1], [0, 0, 1, 1], [], []>} : vector<64x32xf32>, vector<32x32xf32>, vector<64x32xf32> -> vector<64x32xf32>
    %c0_3 = arith.constant 0 : index
    %c0_4 = arith.constant 0 : index
    %3 = vector.load %arg2[%c0_3, %c0_4] : memref<1x32xf32, #tpu.memory_space<vmem>>, vector<1x32xf32>
    %4 = vector.broadcast %3 : vector<1x32xf32> to vector<64x32xf32>
    %5 = arith.addf %2, %4 : vector<64x32xf32>
    %c0_5 = arith.constant 0 : index
    %6 = memref.load %arg7[%c0_5] : memref<3xf32, #tpu.memory_space<smem>>
    %cst_6 = arith.constant 0.000000e+00 : f32
    %7 = vector.broadcast %cst_6 : f32 to vector<8x32xf32>
    %false = arith.constant false
    %8 = vector.broadcast %false : i1 to vector<8x32xi1>
    %false_7 = arith.constant false
    %9 = vector.broadcast %false_7 : i1 to vector<8x32xi1>
    %10 = vector.extract_strided_slice %5 {offsets = [0, 0], sizes = [8, 32], strides = [1, 1]} : vector<64x32xf32> to vector<8x32xf32>
    %11 = arith.addf %7, %10 : vector<8x32xf32>
    %12 = arith.select %9, %10, %11 : vector<8x32xi1>, vector<8x32xf32>
    %13 = vector.broadcast %6 : f32 to vector<8x32xf32>
    %14 = arith.cmpf oge, %12, %13 : vector<8x32xf32>
    %15 = arith.extui %14 : vector<8x32xi1> to vector<8x32xi32>
    %16 = arith.sitofp %15 : vector<8x32xi32> to vector<8x32xf32>
    %17 = vector.extract_strided_slice %5 {offsets = [8, 0], sizes = [8, 32], strides = [1, 1]} : vector<64x32xf32> to vector<8x32xf32>
    %18 = arith.addf %12, %17 : vector<8x32xf32>
    %19 = arith.select %8, %17, %18 : vector<8x32xi1>, vector<8x32xf32>
    %20 = vector.broadcast %6 : f32 to vector<8x32xf32>
    %21 = arith.cmpf oge, %19, %20 : vector<8x32xf32>
    %22 = arith.extui %21 : vector<8x32xi1> to vector<8x32xi32>
    %23 = arith.sitofp %22 : vector<8x32xi32> to vector<8x32xf32>
    %24 = vector.extract_strided_slice %5 {offsets = [16, 0], sizes = [8, 32], strides = [1, 1]} : vector<64x32xf32> to vector<8x32xf32>
    %25 = arith.addf %19, %24 : vector<8x32xf32>
    %26 = arith.select %14, %24, %25 : vector<8x32xi1>, vector<8x32xf32>
    %27 = vector.broadcast %6 : f32 to vector<8x32xf32>
    %28 = arith.cmpf oge, %26, %27 : vector<8x32xf32>
    %29 = arith.extui %28 : vector<8x32xi1> to vector<8x32xi32>
    %30 = arith.sitofp %29 : vector<8x32xi32> to vector<8x32xf32>
    %31 = vector.extract_strided_slice %5 {offsets = [24, 0], sizes = [8, 32], strides = [1, 1]} : vector<64x32xf32> to vector<8x32xf32>
    %32 = arith.addf %26, %31 : vector<8x32xf32>
    %33 = arith.select %21, %31, %32 : vector<8x32xi1>, vector<8x32xf32>
    %34 = vector.broadcast %6 : f32 to vector<8x32xf32>
    %35 = arith.cmpf oge, %33, %34 : vector<8x32xf32>
    %36 = arith.extui %35 : vector<8x32xi1> to vector<8x32xi32>
    %37 = arith.sitofp %36 : vector<8x32xi32> to vector<8x32xf32>
    %38 = vector.extract_strided_slice %5 {offsets = [32, 0], sizes = [8, 32], strides = [1, 1]} : vector<64x32xf32> to vector<8x32xf32>
    %39 = arith.addf %33, %38 : vector<8x32xf32>
    %40 = arith.select %28, %38, %39 : vector<8x32xi1>, vector<8x32xf32>
    %41 = vector.broadcast %6 : f32 to vector<8x32xf32>
    %42 = arith.cmpf oge, %40, %41 : vector<8x32xf32>
    %43 = arith.extui %42 : vector<8x32xi1> to vector<8x32xi32>
    %44 = arith.sitofp %43 : vector<8x32xi32> to vector<8x32xf32>
    %45 = vector.extract_strided_slice %5 {offsets = [40, 0], sizes = [8, 32], strides = [1, 1]} : vector<64x32xf32> to vector<8x32xf32>
    %46 = arith.addf %40, %45 : vector<8x32xf32>
    %47 = arith.select %35, %45, %46 : vector<8x32xi1>, vector<8x32xf32>
    %48 = vector.broadcast %6 : f32 to vector<8x32xf32>
    %49 = arith.cmpf oge, %47, %48 : vector<8x32xf32>
    %50 = arith.extui %49 : vector<8x32xi1> to vector<8x32xi32>
    %51 = arith.sitofp %50 : vector<8x32xi32> to vector<8x32xf32>
    %52 = vector.extract_strided_slice %5 {offsets = [48, 0], sizes = [8, 32], strides = [1, 1]} : vector<64x32xf32> to vector<8x32xf32>
    %53 = arith.addf %47, %52 : vector<8x32xf32>
    %54 = arith.select %42, %52, %53 : vector<8x32xi1>, vector<8x32xf32>
    %55 = vector.broadcast %6 : f32 to vector<8x32xf32>
    %56 = arith.cmpf oge, %54, %55 : vector<8x32xf32>
    %57 = arith.extui %56 : vector<8x32xi1> to vector<8x32xi32>
    %58 = arith.sitofp %57 : vector<8x32xi32> to vector<8x32xf32>
    %59 = vector.extract_strided_slice %5 {offsets = [56, 0], sizes = [8, 32], strides = [1, 1]} : vector<64x32xf32> to vector<8x32xf32>
    %60 = arith.addf %54, %59 : vector<8x32xf32>
    %61 = arith.select %49, %59, %60 : vector<8x32xi1>, vector<8x32xf32>
    %62 = vector.broadcast %6 : f32 to vector<8x32xf32>
    %63 = arith.cmpf oge, %61, %62 : vector<8x32xf32>
    %64 = arith.extui %63 : vector<8x32xi1> to vector<8x32xi32>
    %65 = arith.sitofp %64 : vector<8x32xi32> to vector<8x32xf32>
    %66 = tpu.concatenate %16, %23, %30, %37, %44, %51, %58, %65 in 0 : vector<8x32xf32>, vector<8x32xf32>, vector<8x32xf32>, vector<8x32xf32>, vector<8x32xf32>, vector<8x32xf32>, vector<8x32xf32>, vector<8x32xf32> -> vector<64x32xf32>
    %c0_8 = arith.constant 0 : index
    %c0_9 = arith.constant 0 : index
    %67 = vector.load %arg3[%c0_8, %c0_9] : memref<32x32xf32, #tpu.memory_space<vmem>>, vector<32x32xf32>
    %cst_10 = arith.constant dense<0.000000e+00> : vector<64x32xf32>
    %68 = tpu.matmul %66, %67, %cst_10 {dimension_numbers = #tpu.dot_dimension_numbers<[1], [0], [0], [1], [0, 0, 1, 1], [], []>} : vector<64x32xf32>, vector<32x32xf32>, vector<64x32xf32> -> vector<64x32xf32>
    %c0_11 = arith.constant 0 : index
    %c0_12 = arith.constant 0 : index
    %69 = vector.load %arg4[%c0_11, %c0_12] : memref<1x32xf32, #tpu.memory_space<vmem>>, vector<1x32xf32>
    %70 = vector.broadcast %69 : vector<1x32xf32> to vector<64x32xf32>
    %71 = arith.addf %68, %70 : vector<64x32xf32>
    %c1 = arith.constant 1 : index
    %72 = memref.load %arg7[%c1] : memref<3xf32, #tpu.memory_space<smem>>
    %cst_13 = arith.constant 0.000000e+00 : f32
    %73 = vector.broadcast %cst_13 : f32 to vector<8x32xf32>
    %false_14 = arith.constant false
    %74 = vector.broadcast %false_14 : i1 to vector<8x32xi1>
    %false_15 = arith.constant false
    %75 = vector.broadcast %false_15 : i1 to vector<8x32xi1>
    %76 = vector.extract_strided_slice %71 {offsets = [0, 0], sizes = [8, 32], strides = [1, 1]} : vector<64x32xf32> to vector<8x32xf32>
    %77 = arith.addf %73, %76 : vector<8x32xf32>
    %78 = arith.select %75, %76, %77 : vector<8x32xi1>, vector<8x32xf32>
    %79 = vector.broadcast %72 : f32 to vector<8x32xf32>
    %80 = arith.cmpf oge, %78, %79 : vector<8x32xf32>
    %81 = arith.extui %80 : vector<8x32xi1> to vector<8x32xi32>
    %82 = arith.sitofp %81 : vector<8x32xi32> to vector<8x32xf32>
    %83 = vector.extract_strided_slice %71 {offsets = [8, 0], sizes = [8, 32], strides = [1, 1]} : vector<64x32xf32> to vector<8x32xf32>
    %84 = arith.addf %78, %83 : vector<8x32xf32>
    %85 = arith.select %74, %83, %84 : vector<8x32xi1>, vector<8x32xf32>
    %86 = vector.broadcast %72 : f32 to vector<8x32xf32>
    %87 = arith.cmpf oge, %85, %86 : vector<8x32xf32>
    %88 = arith.extui %87 : vector<8x32xi1> to vector<8x32xi32>
    %89 = arith.sitofp %88 : vector<8x32xi32> to vector<8x32xf32>
    %90 = vector.extract_strided_slice %71 {offsets = [16, 0], sizes = [8, 32], strides = [1, 1]} : vector<64x32xf32> to vector<8x32xf32>
    %91 = arith.addf %85, %90 : vector<8x32xf32>
    %92 = arith.select %80, %90, %91 : vector<8x32xi1>, vector<8x32xf32>
    %93 = vector.broadcast %72 : f32 to vector<8x32xf32>
    %94 = arith.cmpf oge, %92, %93 : vector<8x32xf32>
    %95 = arith.extui %94 : vector<8x32xi1> to vector<8x32xi32>
    %96 = arith.sitofp %95 : vector<8x32xi32> to vector<8x32xf32>
    %97 = vector.extract_strided_slice %71 {offsets = [24, 0], sizes = [8, 32], strides = [1, 1]} : vector<64x32xf32> to vector<8x32xf32>
    %98 = arith.addf %92, %97 : vector<8x32xf32>
    %99 = arith.select %87, %97, %98 : vector<8x32xi1>, vector<8x32xf32>
    %100 = vector.broadcast %72 : f32 to vector<8x32xf32>
    %101 = arith.cmpf oge, %99, %100 : vector<8x32xf32>
    %102 = arith.extui %101 : vector<8x32xi1> to vector<8x32xi32>
    %103 = arith.sitofp %102 : vector<8x32xi32> to vector<8x32xf32>
    %104 = vector.extract_strided_slice %71 {offsets = [32, 0], sizes = [8, 32], strides = [1, 1]} : vector<64x32xf32> to vector<8x32xf32>
    %105 = arith.addf %99, %104 : vector<8x32xf32>
    %106 = arith.select %94, %104, %105 : vector<8x32xi1>, vector<8x32xf32>
    %107 = vector.broadcast %72 : f32 to vector<8x32xf32>
    %108 = arith.cmpf oge, %106, %107 : vector<8x32xf32>
    %109 = arith.extui %108 : vector<8x32xi1> to vector<8x32xi32>
    %110 = arith.sitofp %109 : vector<8x32xi32> to vector<8x32xf32>
    %111 = vector.extract_strided_slice %71 {offsets = [40, 0], sizes = [8, 32], strides = [1, 1]} : vector<64x32xf32> to vector<8x32xf32>
    %112 = arith.addf %106, %111 : vector<8x32xf32>
    %113 = arith.select %101, %111, %112 : vector<8x32xi1>, vector<8x32xf32>
    %114 = vector.broadcast %72 : f32 to vector<8x32xf32>
    %115 = arith.cmpf oge, %113, %114 : vector<8x32xf32>
    %116 = arith.extui %115 : vector<8x32xi1> to vector<8x32xi32>
    %117 = arith.sitofp %116 : vector<8x32xi32> to vector<8x32xf32>
    %118 = vector.extract_strided_slice %71 {offsets = [48, 0], sizes = [8, 32], strides = [1, 1]} : vector<64x32xf32> to vector<8x32xf32>
    %119 = arith.addf %113, %118 : vector<8x32xf32>
    %120 = arith.select %108, %118, %119 : vector<8x32xi1>, vector<8x32xf32>
    %121 = vector.broadcast %72 : f32 to vector<8x32xf32>
    %122 = arith.cmpf oge, %120, %121 : vector<8x32xf32>
    %123 = arith.extui %122 : vector<8x32xi1> to vector<8x32xi32>
    %124 = arith.sitofp %123 : vector<8x32xi32> to vector<8x32xf32>
    %125 = vector.extract_strided_slice %71 {offsets = [56, 0], sizes = [8, 32], strides = [1, 1]} : vector<64x32xf32> to vector<8x32xf32>
    %126 = arith.addf %120, %125 : vector<8x32xf32>
    %127 = arith.select %115, %125, %126 : vector<8x32xi1>, vector<8x32xf32>
    %128 = vector.broadcast %72 : f32 to vector<8x32xf32>
    %129 = arith.cmpf oge, %127, %128 : vector<8x32xf32>
    %130 = arith.extui %129 : vector<8x32xi1> to vector<8x32xi32>
    %131 = arith.sitofp %130 : vector<8x32xi32> to vector<8x32xf32>
    %132 = tpu.concatenate %82, %89, %96, %103, %110, %117, %124, %131 in 0 : vector<8x32xf32>, vector<8x32xf32>, vector<8x32xf32>, vector<8x32xf32>, vector<8x32xf32>, vector<8x32xf32>, vector<8x32xf32>, vector<8x32xf32> -> vector<64x32xf32>
    %c0_16 = arith.constant 0 : index
    %c0_17 = arith.constant 0 : index
    %133 = vector.load %arg5[%c0_16, %c0_17] : memref<32x16xf32, #tpu.memory_space<vmem>>, vector<32x16xf32>
    %cst_18 = arith.constant dense<0.000000e+00> : vector<64x16xf32>
    %134 = tpu.matmul %132, %133, %cst_18 {dimension_numbers = #tpu.dot_dimension_numbers<[1], [0], [0], [1], [0, 0, 1, 1], [], []>} : vector<64x32xf32>, vector<32x16xf32>, vector<64x16xf32> -> vector<64x16xf32>
    %c0_19 = arith.constant 0 : index
    %c0_20 = arith.constant 0 : index
    %135 = vector.load %arg6[%c0_19, %c0_20] : memref<1x16xf32, #tpu.memory_space<vmem>>, vector<1x16xf32>
    %136 = vector.broadcast %135 : vector<1x16xf32> to vector<64x16xf32>
    %137 = arith.addf %134, %136 : vector<64x16xf32>
    %c2 = arith.constant 2 : index
    %138 = memref.load %arg7[%c2] : memref<3xf32, #tpu.memory_space<smem>>
    %cst_21 = arith.constant 0.000000e+00 : f32
    %139 = vector.broadcast %cst_21 : f32 to vector<8x16xf32>
    %false_22 = arith.constant false
    %140 = vector.broadcast %false_22 : i1 to vector<8x16xi1>
    %false_23 = arith.constant false
    %141 = vector.broadcast %false_23 : i1 to vector<8x16xi1>
    %142 = vector.extract_strided_slice %137 {offsets = [0, 0], sizes = [8, 16], strides = [1, 1]} : vector<64x16xf32> to vector<8x16xf32>
    %143 = arith.addf %139, %142 : vector<8x16xf32>
    %144 = arith.select %141, %142, %143 : vector<8x16xi1>, vector<8x16xf32>
    %145 = vector.broadcast %138 : f32 to vector<8x16xf32>
    %146 = arith.cmpf oge, %144, %145 : vector<8x16xf32>
    %147 = arith.extui %146 : vector<8x16xi1> to vector<8x16xi32>
    %148 = arith.sitofp %147 : vector<8x16xi32> to vector<8x16xf32>
    %149 = vector.extract_strided_slice %137 {offsets = [8, 0], sizes = [8, 16], strides = [1, 1]} : vector<64x16xf32> to vector<8x16xf32>
    %150 = arith.addf %144, %149 : vector<8x16xf32>
    %151 = arith.select %140, %149, %150 : vector<8x16xi1>, vector<8x16xf32>
    %152 = vector.broadcast %138 : f32 to vector<8x16xf32>
    %153 = arith.cmpf oge, %151, %152 : vector<8x16xf32>
    %154 = arith.extui %153 : vector<8x16xi1> to vector<8x16xi32>
    %155 = arith.sitofp %154 : vector<8x16xi32> to vector<8x16xf32>
    %156 = vector.extract_strided_slice %137 {offsets = [16, 0], sizes = [8, 16], strides = [1, 1]} : vector<64x16xf32> to vector<8x16xf32>
    %157 = arith.addf %151, %156 : vector<8x16xf32>
    %158 = arith.select %146, %156, %157 : vector<8x16xi1>, vector<8x16xf32>
    %159 = vector.broadcast %138 : f32 to vector<8x16xf32>
    %160 = arith.cmpf oge, %158, %159 : vector<8x16xf32>
    %161 = arith.extui %160 : vector<8x16xi1> to vector<8x16xi32>
    %162 = arith.sitofp %161 : vector<8x16xi32> to vector<8x16xf32>
    %163 = vector.extract_strided_slice %137 {offsets = [24, 0], sizes = [8, 16], strides = [1, 1]} : vector<64x16xf32> to vector<8x16xf32>
    %164 = arith.addf %158, %163 : vector<8x16xf32>
    %165 = arith.select %153, %163, %164 : vector<8x16xi1>, vector<8x16xf32>
    %166 = vector.broadcast %138 : f32 to vector<8x16xf32>
    %167 = arith.cmpf oge, %165, %166 : vector<8x16xf32>
    %168 = arith.extui %167 : vector<8x16xi1> to vector<8x16xi32>
    %169 = arith.sitofp %168 : vector<8x16xi32> to vector<8x16xf32>
    %170 = vector.extract_strided_slice %137 {offsets = [32, 0], sizes = [8, 16], strides = [1, 1]} : vector<64x16xf32> to vector<8x16xf32>
    %171 = arith.addf %165, %170 : vector<8x16xf32>
    %172 = arith.select %160, %170, %171 : vector<8x16xi1>, vector<8x16xf32>
    %173 = vector.broadcast %138 : f32 to vector<8x16xf32>
    %174 = arith.cmpf oge, %172, %173 : vector<8x16xf32>
    %175 = arith.extui %174 : vector<8x16xi1> to vector<8x16xi32>
    %176 = arith.sitofp %175 : vector<8x16xi32> to vector<8x16xf32>
    %177 = vector.extract_strided_slice %137 {offsets = [40, 0], sizes = [8, 16], strides = [1, 1]} : vector<64x16xf32> to vector<8x16xf32>
    %178 = arith.addf %172, %177 : vector<8x16xf32>
    %179 = arith.select %167, %177, %178 : vector<8x16xi1>, vector<8x16xf32>
    %180 = vector.broadcast %138 : f32 to vector<8x16xf32>
    %181 = arith.cmpf oge, %179, %180 : vector<8x16xf32>
    %182 = arith.extui %181 : vector<8x16xi1> to vector<8x16xi32>
    %183 = arith.sitofp %182 : vector<8x16xi32> to vector<8x16xf32>
    %184 = vector.extract_strided_slice %137 {offsets = [48, 0], sizes = [8, 16], strides = [1, 1]} : vector<64x16xf32> to vector<8x16xf32>
    %185 = arith.addf %179, %184 : vector<8x16xf32>
    %186 = arith.select %174, %184, %185 : vector<8x16xi1>, vector<8x16xf32>
    %187 = vector.broadcast %138 : f32 to vector<8x16xf32>
    %188 = arith.cmpf oge, %186, %187 : vector<8x16xf32>
    %189 = arith.extui %188 : vector<8x16xi1> to vector<8x16xi32>
    %190 = arith.sitofp %189 : vector<8x16xi32> to vector<8x16xf32>
    %191 = vector.extract_strided_slice %137 {offsets = [56, 0], sizes = [8, 16], strides = [1, 1]} : vector<64x16xf32> to vector<8x16xf32>
    %192 = arith.addf %186, %191 : vector<8x16xf32>
    %193 = arith.select %181, %191, %192 : vector<8x16xi1>, vector<8x16xf32>
    %194 = vector.broadcast %138 : f32 to vector<8x16xf32>
    %195 = arith.cmpf oge, %193, %194 : vector<8x16xf32>
    %196 = arith.extui %195 : vector<8x16xi1> to vector<8x16xi32>
    %197 = arith.sitofp %196 : vector<8x16xi32> to vector<8x16xf32>
    %198 = tpu.concatenate %148, %155, %162, %169, %176, %183, %190, %197 in 0 : vector<8x16xf32>, vector<8x16xf32>, vector<8x16xf32>, vector<8x16xf32>, vector<8x16xf32>, vector<8x16xf32>, vector<8x16xf32>, vector<8x16xf32> -> vector<64x16xf32>
    %c0_24 = arith.constant 0 : index
    %c0_25 = arith.constant 0 : index
    %199 = vector.load %arg8[%c0_24, %c0_25] : memref<64x16xf32, #tpu.memory_space<vmem>>, vector<64x16xf32>
    tpu.vector_store %arg8[%c0_24, %c0_25], %198 {strides = array<i32>} : memref<64x16xf32, #tpu.memory_space<vmem>>, vector<64x16xf32>,
    return
  }
}

</mosaic_0001>

<bundles_post_ra>
// kernel: snn_forward.1
= control target key start
LH: loop header
LB: loop body
LE: loop exit
PB: predicated region body
PF: predicated region fallthrough
CT: control target
= control target key end

     0   :  { %13 = vsyncpa [#allocation3], 0  ;;  %s981_s0 = inlined_call_operand.vmem [shape: f32[64,32], index: 0, kind: input, shape index: {}]   ;;  %s982_s1 = inlined_call_operand.vmem [shape: f32[32,32], index: 1, kind: input, shape index: {}]   ;;  %s983_s2 = inlined_call_operand.vmem [shape: f32[1,32], index: 2, kind: input, shape index: {}]   ;;  %s984_s3 = inlined_call_operand.vmem [shape: f32[32,32], index: 3, kind: input, shape index: {}]   ;;  %s985_s4 = inlined_call_operand.vmem [shape: f32[1,32], index: 4, kind: input, shape index: {}]   ;;  %s986_s5 = inlined_call_operand.vmem [shape: f32[32,16], index: 5, kind: input, shape index: {}]   ;;  %s987_s6 = inlined_call_operand.vmem [shape: f32[1,16], index: 6, kind: input, shape index: {}]   ;;  %s988_s7 = inlined_call_operand.vmem [shape: f32[3], index: 7, kind: input, shape index: {}]   ;;  %s989_s8 = inlined_call_operand.vmem [shape: f32[64,16], index: 8, kind: output, shape index: {}]  }
   0x1   :  { %s34_s29 = sshll.u32 %s988_s7, 4  ;;  %s35_s29 = int_to_ptr.vmem [resolvable:$true] %s34_s29 }
   0x2   :  { %s764_s30 = scalar_lea.vmem %s35_s29, 16  ;;  %p769_p1 = scmp.lt.s32.totalorder %s35_s29, %s35_s29 }
   0x3   :  { %p765_p0 = scmp.ne.s32.totalorder %s35_s29, %s764_s30  ;;  %p770_p2 = scmp.lt.s32.totalorder %s764_s30, %s764_s30 }
   0x5   :  { %p771_p3 = por %p770_p2, %p769_p1 }
   0x7   :  { %p772_p4 = pnand %p771_p3, %p765_p0 }
   0x9   :  { %775 = shalt.err (!%p772_p4)
}
   0xa   :  { %s778_s9 = smov [#allocation2]  }
   0xb   :  { %37 = dma.vmem_to_smem %s35_s29, 16, %s778_s9, [#allocation3]  }
   0xc   :  { %776 = dma.done.wait [#allocation3], 16  }
   0xd   :  { %777 = vsyncadd [#allocation3], 4294967280 }
   0xe   :  { %41 = sfence }
   0xf   :  { %v53_v0 = vld [vmem:[%s982_s1 + $0x18] sm:$0xff]  ;;  %v52_v1 = vld [vmem:[%s982_s1 + $0x10] sm:$0xff]  ;;  %vm61_vm0 = vcmask 261120   ;;  %v42_v2 = vld [vmem:[%s981_s0] sm:$0xff]  ;;  %s191_s16 = sld [smem:[#allocation2]]  ;;  %v779_v25 = vmov 0.0  }
  0x10   :  { %694 = vmatprep.subr.mxu0 %v53_v0  ;;  %754 = vmatprep.subr.mxu1 %v53_v0  ;;  %v51_v3 = vld [vmem:[%s982_s1 + $0x8] sm:$0xff]  ;;  %v50_v4 = vld [vmem:[%s982_s1] sm:$0xff]  ;;  %v44_v6 = vld [vmem:[%s981_s0 + $0x10] sm:$0xff]  ;;  %s631_s1 = sld [smem:[#allocation2 + $0x1]] }
  0x11   :  { %695 = vmatpush3.msra.mxu0 %v53_v0  ;;  %702 = vmatprep.mubr.msk.f32.mxu0 %vm61_vm0, %v42_v2  ;;  %v43_v5 = vld [vmem:[%s981_s0 + $0x8] sm:$0xff]  ;;  %v46_v7 = vld [vmem:[%s981_s0 + $0x20] sm:$0xff]  ;;  %v48_v9 = vld [vmem:[%s981_s0 + $0x30] sm:$0xff] }
  0x12   :  { %696 = vmatprep.subr.mxu0 %v52_v1  ;;  %758 = vmatpush3.msra.mxu1 %v53_v0  ;;  %v47_v8 = vld [vmem:[%s981_s0 + $0x28] sm:$0xff]  ;;  %v45_v10 = vld [vmem:[%s981_s0 + $0x18] sm:$0xff]  ;;  %v233_v13 = vld [vmem:[%s984_s3 + $0x10] sm:$0xff] }
  0x13   :  { %697 = vmatpush3.msra.mxu0 %v52_v1  ;;  %755 = vmatprep.subr.mxu1 %v52_v1  ;;  %v49_v11 = vld [vmem:[%s981_s0 + $0x38] sm:$0xff]  ;;  %v232_v14 = vld [vmem:[%s984_s3 + $0x8] sm:$0xff]  ;;  %v231_v15 = vld [vmem:[%s984_s3] sm:$0xff] }
  0x14   :  { %698 = vmatprep.subr.mxu0 %v51_v3  ;;  %759 = vmatpush3.msra.mxu1 %v52_v1  ;;  %v234_v12 = vld [vmem:[%s984_s3 + $0x18] sm:$0xff]  ;;  %v605_v17 = vld [vmem:[%s983_s2] ss:$0 sm:$0xff]  ;;  %v413_v57 = vld [vmem:[%s986_s5 + $0x10] sm:$0xff] }
  0x15   :  { %699 = vmatpush3.msra.mxu0 %v51_v3  ;;  %756 = vmatprep.subr.mxu1 %v51_v3  ;;  %v193_v19 = vstv %s191_s16  ;;  %v414_v56 = vld [vmem:[%s986_s5 + $0x18] sm:$0xff]  ;;  %v412_v58 = vld [vmem:[%s986_s5 + $0x8] sm:$0xff]  ;;  %v411_v59 = vld [vmem:[%s986_s5] sm:$0xff] }
  0x16   :  { %700 = vmatprep.subr.mxu0 %v50_v4  ;;  %760 = vmatpush3.msra.mxu1 %v51_v3  ;;  %v622_v61 = vld [vmem:[%s985_s4] ss:$0 sm:$0xff]  ;;  %v373_v63 = vstv %s631_s1  ;;  %s649_s4 = sld [smem:[#allocation2 + $0x2]] }
  0x17   :  { %701 = vmatpush3.msra.mxu0 %v50_v4  ;;  %757 = vmatprep.subr.mxu1 %v50_v4 }
  0x18   :  { %703 = vmatmul.mubr.msk.f32.vlgmr.msra.gmra.mxu0 %vm61_vm0, %v43_v5  ;;  %761 = vmatpush3.msra.mxu1 %v50_v4 }
  0x19   :  { %705 = vmatprep.mubr.msk.f32.mxu0 %vm61_vm0, %v44_v6  ;;  %708 = vmatprep.mubr.msk.f32.mxu1 %vm61_vm0, %v46_v7 }
  0x1a   :  { %709 = vmatmul.mubr.msk.f32.vlgmr.msra.gmra.mxu1 %vm61_vm0, %v47_v8  ;;  %714 = vmatprep.subr.mxu1 %v234_v12 }
  0x1b   :  { %711 = vmatprep.mubr.msk.f32.mxu1 %vm61_vm0, %v48_v9  ;;  %715 = vmatpush3.msra.mxu1 %v234_v12 }
  0x1c   :  { %706 = vmatmul.mubr.msk.f32.gmra.mxu0 %vm61_vm0, %v45_v10  ;;  %716 = vmatprep.subr.mxu1 %v233_v13 }
  0x1d   :  { %717 = vmatpush3.msra.mxu1 %v233_v13  ;;  %734 = vmatprep.subr.mxu0 %v414_v56 }
  0x1e   :  { %712 = vmatmul.mubr.msk.f32.gmra.mxu1 %vm61_vm0, %v49_v11  ;;  %718 = vmatprep.subr.mxu1 %v232_v14 }
  0x1f   :  { %719 = vmatpush3.msra.mxu1 %v232_v14  ;;  %735 = vmatpush3.msra.mxu0 %v414_v56 }
  0x20   :  { %720 = vmatprep.subr.mxu1 %v231_v15  ;;  %736 = vmatprep.subr.mxu0 %v413_v57 }
  0x21   :  { %721 = vmatpush3.msra.mxu1 %v231_v15  ;;  %737 = vmatpush3.msra.mxu0 %v413_v57 }
  0x22   :  { %738 = vmatprep.subr.mxu0 %v412_v58 }
  0x23   :  { %739 = vmatpush3.msra.mxu0 %v412_v58 }
  0x24   :  { %740 = vmatprep.subr.mxu0 %v411_v59 }
  0x25   :  { %741 = vmatpush3.msra.mxu0 %v411_v59 }
  0xd8   :  { %v704_v16 = vpop.f32.mrf.mxu0 }
  0xd9   :  { %v158_v20 = vadd.f32 %v704_v16, %v605_v17 }
  0xda   :  { %v152_v18 = vpop.f32.mrf.mxu0  ;;  %v710_v27 = vpop.f32.mrf.mxu1 }
  0xdb   :  { %v153_v21 = vadd.f32 %v605_v17, %v152_v18  ;;  %v178_v40 = vadd.f32 %v710_v27, %v605_v17 }
  0xdc   :  { %v707_v22 = vpop.f32.mrf.mxu0  ;;  %v172_v32 = vpop.f32.mrf.mxu1 }
  0xdd   :  { %vm194_vm1 = vcmp.ge.f32.partialorder %v153_v21, %v193_v19  ;;  %v197_v23 = vadd.f32 %v158_v20, %v153_v21  ;;  %v168_v31 = vadd.f32 %v707_v22, %v605_v17  ;;  %v173_v36 = vadd.f32 %v605_v17, %v172_v32 }
  0xde   :  { %v162_v24 = vpop.f32.mrf.mxu0  ;;  %v614_v26 = vsel %vm194_vm1, 1.0, %v779_v25  ;;  %v713_v35 = vpop.f32.mrf.mxu1 }
  0xdf   :  { %vm198_vm2 = vcmp.ge.f32.partialorder %v197_v23, %v193_v19  ;;  %v163_v28 = vadd.f32 %v605_v17, %v162_v24  ;;  %722 = vmatprep.mubr.msk.f32.mxu1 %vm61_vm0, %v614_v26  ;;  %v188_v49 = vadd.f32 %v713_v35, %v605_v17 }
  0xe0   :  { %v615_v29 = vsel %vm198_vm2, 1.0, %v779_v25  ;;  %v182_v41 = vpop.f32.mrf.mxu1 }
  0xe1   :  { %v201_v30 = vadd.f32 %v197_v23, %v163_v28  ;;  %723 = vmatmul.mubr.msk.f32.vlgmr.msra.gmra.mxu1 %vm61_vm0, %v615_v29  ;;  %v183_v45 = vadd.f32 %v605_v17, %v182_v41 }
  0xe3   :  { %v202_v33 = vsel %vm194_vm1, %v163_v28, %v201_v30 }
  0xe4   :  { %v206_v34 = vadd.f32 %v202_v33, %v168_v31  ;;  %vm203_vm3 = vcmp.ge.f32.partialorder %v202_v33, %v193_v19 }
  0xe5   :  { %v616_v37 = vsel %vm203_vm3, 1.0, %v779_v25 }
  0xe6   :  { %v207_v38 = vsel %vm198_vm2, %v168_v31, %v206_v34  ;;  %725 = vmatprep.mubr.msk.f32.mxu1 %vm61_vm0, %v616_v37  ;;  %v640_v37 = vld [vmem:[%s987_s6] ss:$0 sm:$0xff]  ;;  %vm591_vm2 = vcmask 130048  }
  0xe7   :  { %vm208_vm4 = vcmp.ge.f32.partialorder %v207_v38, %v193_v19  ;;  %v211_v39 = vadd.f32 %v207_v38, %v173_v36 }
  0xe8   :  { %v617_v42 = vsel %vm208_vm4, 1.0, %v779_v25 }
  0xe9   :  { %v212_v43 = vsel %vm203_vm3, %v173_v36, %v211_v39  ;;  %726 = vmatmul.mubr.msk.f32.gmra.mxu1 %vm61_vm0, %v617_v42  ;;  %v553_v39 = vstv %s649_s4 }
  0xea   :  { %v216_v44 = vadd.f32 %v212_v43, %v178_v40  ;;  %vm213_vm5 = vcmp.ge.f32.partialorder %v212_v43, %v193_v19 }
  0xeb   :  { %v618_v46 = vsel %vm213_vm5, 1.0, %v779_v25 }
  0xec   :  { %v217_v47 = vsel %vm208_vm4, %v178_v40, %v216_v44  ;;  %728 = vmatprep.mubr.msk.f32.mxu1 %vm61_vm0, %v618_v46 }
  0xed   :  { %v221_v48 = vadd.f32 %v217_v47, %v183_v45  ;;  %vm218_vm6 = vcmp.ge.f32.partialorder %v217_v47, %v193_v19 }
  0xee   :  { %v619_v50 = vsel %vm218_vm6, 1.0, %v779_v25 }
  0xef   :  { %729 = vmatmul.mubr.msk.f32.gmra.mxu1 %vm61_vm0, %v619_v50  ;;  %v222_v51 = vsel %vm213_vm5, %v183_v45, %v221_v48 }
  0xf0   :  { %vm223_vm7 = vcmp.ge.f32.partialorder %v222_v51, %v193_v19  ;;  %v226_v52 = vadd.f32 %v222_v51, %v188_v49 }
  0xf1   :  { %v620_v53 = vsel %vm223_vm7, 1.0, %v779_v25 }
  0xf2   :  { %731 = vmatprep.mubr.msk.f32.mxu1 %vm61_vm0, %v620_v53  ;;  %v227_v54 = vsel %vm218_vm6, %v188_v49, %v226_v52 }
  0xf3   :  { %vm228_vm8 = vcmp.ge.f32.partialorder %v227_v54, %v193_v19 }
  0xf4   :  { %v621_v55 = vsel %vm228_vm8, 1.0, %v779_v25 }
  0xf5   :  { %732 = vmatmul.mubr.msk.f32.gmra.mxu1 %vm61_vm0, %v621_v55 }
 0x1a1   :  { %v724_v60 = vpop.f32.mrf.mxu1 }
 0x1a2   :  { %v338_v0 = vadd.f32 %v724_v60, %v622_v61 }
 0x1a3   :  { %v332_v62 = vpop.f32.mrf.mxu1 }
 0x1a4   :  { %v333_v1 = vadd.f32 %v622_v61, %v332_v62 }
 0x1a6   :  { %vm374_vm9 = vcmp.ge.f32.partialorder %v333_v1, %v373_v63  ;;  %v377_v2 = vadd.f32 %v338_v0, %v333_v1 }
 0x1a7   :  { %v632_v3 = vsel %vm374_vm9, 1.0, %v779_v25 }
 0x1a8   :  { %vm378_vm10 = vcmp.ge.f32.partialorder %v377_v2, %v373_v63  ;;  %742 = vmatprep.mubr.msk.f32.mxu0 %vm61_vm0, %v632_v3 }
 0x1a9   :  { %v633_v4 = vsel %vm378_vm10, 1.0, %v779_v25  ;;  %v727_v5 = vpop.f32.mrf.mxu1 }
 0x1aa   :  { %743 = vmatmul.mubr.msk.f32.vlgmr.msra.gmra.mxu0 %vm61_vm0, %v633_v4  ;;  %v348_v9 = vadd.f32 %v727_v5, %v622_v61 }
 0x1ab   :  { %v342_v6 = vpop.f32.mrf.mxu1 }
 0x1ac   :  { %v343_v7 = vadd.f32 %v622_v61, %v342_v6 }
 0x1ae   :  { %v381_v8 = vadd.f32 %v377_v2, %v343_v7 }
 0x1af   :  { %v730_v10 = vpop.f32.mrf.mxu1 }
 0x1b0   :  { %v382_v11 = vsel %vm374_vm9, %v343_v7, %v381_v8  ;;  %v358_v18 = vadd.f32 %v730_v10, %v622_v61 }
 0x1b1   :  { %v386_v12 = vadd.f32 %v382_v11, %v348_v9  ;;  %v352_v13 = vpop.f32.mrf.mxu1  ;;  %vm383_vm11 = vcmp.ge.f32.partialorder %v382_v11, %v373_v63 }
 0x1b2   :  { %v353_v14 = vadd.f32 %v622_v61, %v352_v13  ;;  %v634_v15 = vsel %vm383_vm11, 1.0, %v779_v25 }
 0x1b3   :  { %v387_v16 = vsel %vm378_vm10, %v348_v9, %v386_v12  ;;  %745 = vmatprep.mubr.msk.f32.mxu0 %vm61_vm0, %v634_v15 }
 0x1b4   :  { %v391_v17 = vadd.f32 %v387_v16, %v353_v14  ;;  %vm388_vm12 = vcmp.ge.f32.partialorder %v387_v16, %v373_v63 }
 0x1b5   :  { %v733_v19 = vpop.f32.mrf.mxu1  ;;  %v635_v20 = vsel %vm388_vm12, 1.0, %v779_v25 }
 0x1b6   :  { %v392_v21 = vsel %vm383_vm11, %v353_v14, %v391_v17  ;;  %746 = vmatmul.mubr.msk.f32.gmra.mxu0 %vm61_vm0, %v635_v20  ;;  %v368_v29 = vadd.f32 %v733_v19, %v622_v61 }
 0x1b7   :  { %v396_v22 = vadd.f32 %v392_v21, %v358_v18  ;;  %v362_v23 = vpop.f32.mrf.mxu1  ;;  %vm393_vm13 = vcmp.ge.f32.partialorder %v392_v21, %v373_v63 }
 0x1b8   :  { %v363_v24 = vadd.f32 %v622_v61, %v362_v23  ;;  %v636_v26 = vsel %vm393_vm13, 1.0, %v779_v25 }
 0x1b9   :  { %v397_v27 = vsel %vm388_vm12, %v358_v18, %v396_v22  ;;  %748 = vmatprep.mubr.msk.f32.mxu0 %vm61_vm0, %v636_v26 }
 0x1ba   :  { %v401_v28 = vadd.f32 %v397_v27, %v363_v24  ;;  %vm398_vm14 = vcmp.ge.f32.partialorder %v397_v27, %v373_v63 }
 0x1bb   :  { %v637_v30 = vsel %vm398_vm14, 1.0, %v779_v25 }
 0x1bc   :  { %749 = vmatmul.mubr.msk.f32.gmra.mxu0 %vm61_vm0, %v637_v30  ;;  %v402_v31 = vsel %vm393_vm13, %v363_v24, %v401_v28 }
 0x1bd   :  { %vm403_vm15 = vcmp.ge.f32.partialorder %v402_v31, %v373_v63  ;;  %v406_v32 = vadd.f32 %v402_v31, %v368_v29 }
 0x1be   :  { %v638_v33 = vsel %vm403_vm15, 1.0, %v779_v25 }
 0x1bf   :  { %751 = vmatprep.mubr.msk.f32.mxu0 %vm61_vm0, %v638_v33  ;;  %v407_v34 = vsel %vm398_vm14, %v368_v29, %v406_v32 }
 0x1c0   :  { %vm408_vm1 = vcmp.ge.f32.partialorder %v407_v34, %v373_v63 }
 0x1c1   :  { %v639_v35 = vsel %vm408_vm1, 1.0, %v779_v25 }
 0x1c2   :  { %752 = vmatmul.mubr.msk.f32.gmra.mxu0 %vm61_vm0, %v639_v35 }
 0x26a   :  { %v744_v36 = vpop.f32.mrf.mxu0 }
 0x26b   :  { %v518_v40 = vadd.f32 %v744_v36, %v640_v37 }
 0x26c   :  { %v512_v38 = vpop.f32.mrf.mxu0 }
 0x26d   :  { %v513_v41 = vadd.f32 %v640_v37, %v512_v38 }
 0x26f   :  { %vm554_vm3 = vcmp.ge.f32.partialorder %v513_v41, %v553_v39  ;;  %v557_v42 = vadd.f32 %v518_v40, %v513_v41 }
 0x270   :  { %v650_v43 = vsel %vm554_vm3, 1.0, %v779_v25 }
 0x271   :  { %vm558_vm4 = vcmp.ge.f32.partialorder %v557_v42, %v553_v39  ;;  %592 = vst.msk [vmem:[%s989_s8] sm:$0xff] %vm591_vm2, %v650_v43 }
 0x272   :  { %v651_v44 = vsel %vm558_vm4, 1.0, %v779_v25 }
 0x273   :  { %593 = vst.msk [vmem:[%s989_s8 + $0x8] sm:$0xff] %vm591_vm2, %v651_v44 }
 0x276   :  { %v747_v45 = vpop.f32.mrf.mxu0 }
 0x277   :  { %v528_v49 = vadd.f32 %v747_v45, %v640_v37 }
 0x278   :  { %v522_v46 = vpop.f32.mrf.mxu0 }
 0x279   :  { %v523_v47 = vadd.f32 %v640_v37, %v522_v46 }
 0x27b   :  { %v561_v48 = vadd.f32 %v557_v42, %v523_v47 }
 0x27c   :  { %v750_v50 = vpop.f32.mrf.mxu0 }
 0x27d   :  { %v562_v51 = vsel %vm554_vm3, %v523_v47, %v561_v48  ;;  %v538_v58 = vadd.f32 %v750_v50, %v640_v37 }
 0x27e   :  { %vm563_vm0 = vcmp.ge.f32.partialorder %v562_v51, %v553_v39  ;;  %v566_v52 = vadd.f32 %v562_v51, %v528_v49  ;;  %v532_v53 = vpop.f32.mrf.mxu0 }
 0x27f   :  { %v652_v54 = vsel %vm563_vm0, 1.0, %v779_v25  ;;  %v533_v55 = vadd.f32 %v640_v37, %v532_v53 }
 0x280   :  { %594 = vst.msk [vmem:[%s989_s8 + $0x10] sm:$0xff] %vm591_vm2, %v652_v54  ;;  %v567_v56 = vsel %vm558_vm4, %v528_v49, %v566_v52 }
 0x281   :  { %vm568_vm5 = vcmp.ge.f32.partialorder %v567_v56, %v553_v39  ;;  %v571_v57 = vadd.f32 %v567_v56, %v533_v55 }
 0x282   :  { %v653_v59 = vsel %vm568_vm5, 1.0, %v779_v25  ;;  %v753_v60 = vpop.f32.mrf.mxu0 }
 0x283   :  { %v572_v61 = vsel %vm563_vm0, %v533_v55, %v571_v57  ;;  %595 = vst.msk [vmem:[%s989_s8 + $0x18] sm:$0xff] %vm591_vm2, %v653_v59  ;;  %v548_v4 = vadd.f32 %v753_v60, %v640_v37 }
 0x284   :  { %vm573_vm6 = vcmp.ge.f32.partialorder %v572_v61, %v553_v39  ;;  %v576_v62 = vadd.f32 %v572_v61, %v538_v58  ;;  %v542_v63 = vpop.f32.mrf.mxu0 }
 0x285   :  { %v654_v0 = vsel %vm573_vm6, 1.0, %v779_v25  ;;  %v543_v1 = vadd.f32 %v640_v37, %v542_v63 }
 0x286   :  { %596 = vst.msk [vmem:[%s989_s8 + $0x20] sm:$0xff] %vm591_vm2, %v654_v0  ;;  %v577_v2 = vsel %vm568_vm5, %v538_v58, %v576_v62 }
 0x287   :  { %vm578_vm7 = vcmp.ge.f32.partialorder %v577_v2, %v553_v39  ;;  %v581_v3 = vadd.f32 %v577_v2, %v543_v1 }
 0x288   :  { %v655_v5 = vsel %vm578_vm7, 1.0, %v779_v25 }
 0x289   :  { %v582_v6 = vsel %vm573_vm6, %v543_v1, %v581_v3  ;;  %597 = vst.msk [vmem:[%s989_s8 + $0x28] sm:$0xff] %vm591_vm2, %v655_v5 }
 0x28a   :  { %vm583_vm8 = vcmp.ge.f32.partialorder %v582_v6, %v553_v39  ;;  %v586_v7 = vadd.f32 %v582_v6, %v548_v4 }
 0x28b   :  { %v656_v8 = vsel %vm583_vm8, 1.0, %v779_v25 }
 0x28c   :  { %v587_v9 = vsel %vm578_vm7, %v548_v4, %v586_v7  ;;  %598 = vst.msk [vmem:[%s989_s8 + $0x30] sm:$0xff] %vm591_vm2, %v656_v8 }
 0x28d   :  { %vm588_vm9 = vcmp.ge.f32.partialorder %v587_v9, %v553_v39 }
 0x28e   :  { %v657_v10 = vsel %vm588_vm9, 1.0, %v779_v25 }
 0x28f   :  { %599 = vst.msk [vmem:[%s989_s8 + $0x38] sm:$0xff] %vm591_vm2, %v657_v10 }
 0x290   :  { %604 = vsyncpa [#allocation3], 1 }

</bundles_post_ra>
